<compile_context>
chip_gen: v5e
topology: v5e:2x2
jax: 0.10.0
libtpu: 0.0.40
codegen_flags: <defaults>
</compile_context>

<pallas_src>
import functools

import jax
import jax.numpy as jnp
from jax.experimental import pallas as pl
from jax.experimental.pallas import tpu as pltpu

_LANE = 128


def _round_up(n: int, m: int) -> int:
    return (n + m - 1) // m * m


def mlp_kernel(x_ref, w1_ref, b1_ref, w2_ref, b2_ref, o_ref):
    # Linear 1 (MXU) + bias + ReLU (VPU) + Linear 2 (MXU) + bias, all VMEM-resident.
    x = x_ref[...]
    h = jnp.dot(x, w1_ref[...], preferred_element_type=jnp.float32) + b1_ref[...]
    h = jnp.maximum(h, 0.0)
    y = jnp.dot(h, w2_ref[...], preferred_element_type=jnp.float32) + b2_ref[...]
    o_ref[...] = y.astype(o_ref.dtype)


def prepare_params(w1, b1, w2, b2):
    """One-time weight preparation (outside the per-step forward path).

    Pads hidden and n_actions up to 128 lanes with zeros so the kernel's
    matmuls and the output store are lane-dense.  Zero padding is inert:
    padded hidden columns produce h == 0 after bias(0)+ReLU, and padded w2
    rows/cols contribute nothing.
    """
    obs_size, hidden_size = w1.shape
    n_actions = w2.shape[1]
    hid_p = _round_up(hidden_size, _LANE)
    act_p = _round_up(n_actions, _LANE)

    w1_p = jnp.zeros((obs_size, hid_p), w1.dtype).at[:, :hidden_size].set(w1)
    b1_p = jnp.zeros((1, hid_p), b1.dtype).at[:, :hidden_size].set(b1.reshape(1, -1))
    w2_p = jnp.zeros((hid_p, act_p), w2.dtype).at[:hidden_size, :n_actions].set(w2)
    b2_p = jnp.zeros((1, act_p), b2.dtype).at[:, :n_actions].set(b2.reshape(1, -1))
    return w1_p, b1_p, w2_p, b2_p


@functools.partial(jax.jit, static_argnames=("n_actions",))
def net_forward(x, w1_p, b1_p, w2_p, b2_p, *, n_actions):
    """Net.forward: Linear(obs->hidden) -> ReLU -> Linear(hidden->n_actions).

    `x` is passed unpadded; the pre-padded weights make both contractions and
    the output store lane-dense.  The padded (B, 128) result is trimmed back
    to (B, n_actions).
    """
    B = x.shape[0]
    act_p = w2_p.shape[1]

    vmem_spec = pl.BlockSpec(memory_space=pltpu.MemorySpace.VMEM)
    out_p = pl.pallas_call(
        mlp_kernel,
        out_shape=jax.ShapeDtypeStruct((B, act_p), jnp.float32),
        in_specs=[vmem_spec] * 5,
        out_specs=vmem_spec,
    )(x, w1_p, b1_p, w2_p, b2_p)

    return out_p[:, :n_actions]


def reference_forward(x, w1, b1, w2, b2):
    h = jnp.maximum(x @ w1 + b1, 0.0)
    return h @ w2 + b2


if __name__ == "__main__":
    # FrozenLake-tweaked Net: obs_size=16 (one-hot states), hidden=32, n_actions=4.
    # B=128 demonstrates the batched call site the kernel is sized for.
    B, obs_size, hidden_size, n_actions = 128, 16, 32, 4

    key = jax.random.PRNGKey(0)
    k1, k2, k3, k4, kx = jax.random.split(key, 5)

    # Deterministic synthetic parameters (PyTorch Linear stores [out, in];
    # we store them transposed as [in, out]).
    w1 = jax.random.normal(k1, (obs_size, hidden_size), jnp.float32) * 0.1
    b1 = jax.random.normal(k2, (1, hidden_size), jnp.float32) * 0.1
    w2 = jax.random.normal(k3, (hidden_size, n_actions), jnp.float32) * 0.1
    b2 = jax.random.normal(k4, (1, n_actions), jnp.float32) * 0.1

    x = jax.random.normal(kx, (B, obs_size), jnp.float32)

    # One-time weight prep (hoisted out of the per-step forward path).
    params_p = prepare_params(w1, b1, w2, b2)

    out = net_forward(x, *params_p, n_actions=n_actions)
    out = jax.block_until_ready(out)

    ref = reference_forward(x, w1, b1, w2, b2)
    assert out.shape == (B, n_actions)
    assert jnp.allclose(out, ref, atol=1e-5, rtol=1e-5)

    print("KERNEL_OK")
</pallas_src>

<mosaic_0001>
module attributes {stable_mosaic.version = 11 : i64} {
  func.func @mlp_kernel(%arg0: memref<128x16xf32, #tpu.memory_space<vmem>>, %arg1: memref<16x128xf32, #tpu.memory_space<vmem>>, %arg2: memref<1x128xf32, #tpu.memory_space<vmem>>, %arg3: memref<128x128xf32, #tpu.memory_space<vmem>>, %arg4: memref<1x128xf32, #tpu.memory_space<vmem>>, %arg5: memref<128x128xf32, #tpu.memory_space<vmem>>) attributes {dimension_semantics = [], scalar_prefetch = 0 : i64, scratch_operands = 0 : i64, tpu.core_type = #tpu.core_type<tc>} {
    %c0 = arith.constant 0 : index
    %c0_0 = arith.constant 0 : index
    %0 = vector.load %arg0[%c0, %c0_0] : memref<128x16xf32, #tpu.memory_space<vmem>>, vector<128x16xf32>
    %c0_1 = arith.constant 0 : index
    %c0_2 = arith.constant 0 : index
    %1 = vector.load %arg1[%c0_1, %c0_2] : memref<16x128xf32, #tpu.memory_space<vmem>>, vector<16x128xf32>
    %cst = arith.constant dense<0.000000e+00> : vector<128x128xf32>
    %2 = tpu.matmul %0, %1, %cst {dimension_numbers = #tpu.dot_dimension_numbers<[1], [0], [0], [1], [0, 0, 1, 1], [], []>} : vector<128x16xf32>, vector<16x128xf32>, vector<128x128xf32> -> vector<128x128xf32>
    %c0_3 = arith.constant 0 : index
    %c0_4 = arith.constant 0 : index
    %3 = vector.load %arg2[%c0_3, %c0_4] : memref<1x128xf32, #tpu.memory_space<vmem>>, vector<1x128xf32>
    %4 = vector.broadcast %3 : vector<1x128xf32> to vector<128x128xf32>
    %5 = arith.addf %2, %4 : vector<128x128xf32>
    %cst_5 = arith.constant 0.000000e+00 : f32
    %6 = vector.broadcast %cst_5 : f32 to vector<128x128xf32>
    %7 = arith.maximumf %5, %6 : vector<128x128xf32>
    %c0_6 = arith.constant 0 : index
    %c0_7 = arith.constant 0 : index
    %8 = vector.load %arg3[%c0_6, %c0_7] : memref<128x128xf32, #tpu.memory_space<vmem>>, vector<128x128xf32>
    %cst_8 = arith.constant dense<0.000000e+00> : vector<128x128xf32>
    %9 = tpu.matmul %7, %8, %cst_8 {dimension_numbers = #tpu.dot_dimension_numbers<[1], [0], [0], [1], [0, 0, 1, 1], [], []>} : vector<128x128xf32>, vector<128x128xf32>, vector<128x128xf32> -> vector<128x128xf32>
    %c0_9 = arith.constant 0 : index
    %c0_10 = arith.constant 0 : index
    %10 = vector.load %arg4[%c0_9, %c0_10] : memref<1x128xf32, #tpu.memory_space<vmem>>, vector<1x128xf32>
    %11 = vector.broadcast %10 : vector<1x128xf32> to vector<128x128xf32>
    %12 = arith.addf %9, %11 : vector<128x128xf32>
    %c0_11 = arith.constant 0 : index
    %c0_12 = arith.constant 0 : index
    %13 = vector.load %arg5[%c0_11, %c0_12] : memref<128x128xf32, #tpu.memory_space<vmem>>, vector<128x128xf32>
    tpu.vector_store %arg5[%c0_11, %c0_12], %12 {strides = array<i32>} : memref<128x128xf32, #tpu.memory_space<vmem>>, vector<128x128xf32>,
    return
  }
}

</mosaic_0001>

<bundles_post_ra>
// kernel: net_forward.1
= control target key start
LH: loop header
LB: loop body
LE: loop exit
PB: predicated region body
PF: predicated region fallthrough
CT: control target
= control target key end

     0   :  { %vm42_vm0 = vcmask 130048   ;;  %s531_s1 = inlined_call_operand.vmem [shape: f32[16,128], index: 1, kind: input, shape index: {}]   ;;  %s532_s0 = inlined_call_operand.vmem [shape: f32[128,16], index: 0, kind: input, shape index: {}]   ;;  %s533_s2 = inlined_call_operand.vmem [shape: f32[1,128], index: 2, kind: input, shape index: {}]   ;;  %s534_s3 = inlined_call_operand.vmem [shape: f32[128,128], index: 3, kind: input, shape index: {}]   ;;  %s535_s4 = inlined_call_operand.vmem [shape: f32[1,128], index: 4, kind: input, shape index: {}]   ;;  %s536_s5 = inlined_call_operand.vmem [shape: f32[128,128], index: 5, kind: output, shape index: {}]  }
   0x1   :  { %v37_v0 = vld [vmem:[%s531_s1 + $0x8] sm:$0xff]  ;;  %v36_v1 = vld [vmem:[%s531_s1] sm:$0xff]  ;;  %v22_v4 = vld [vmem:[%s532_s0 + $0x10] sm:$0xff] }
   0x2   :  { %105 = vmatpush.msra.mxu0 %v37_v0  ;;  %v20_v2 = vld [vmem:[%s532_s0] sm:$0xff]  ;;  %293 = vmatpush.msra.mxu3 %v37_v0  ;;  %v21_v3 = vld [vmem:[%s532_s0 + $0x8] sm:$0xff]  ;;  %v23_v5 = vld [vmem:[%s532_s0 + $0x18] sm:$0xff] }
   0x3   :  { %v30_v6 = vld [vmem:[%s532_s0 + $0x50] sm:$0xff]  ;;  %v24_v7 = vld [vmem:[%s532_s0 + $0x20] sm:$0xff]  ;;  %v31_v8 = vld [vmem:[%s532_s0 + $0x58] sm:$0xff] }
   0x4   :  { %106 = vmatpush.msra.mxu0 %v36_v1  ;;  %294 = vmatpush.msra.mxu3 %v36_v1  ;;  %v25_v9 = vld [vmem:[%s532_s0 + $0x28] sm:$0xff]  ;;  %v32_v10 = vld [vmem:[%s532_s0 + $0x60] sm:$0xff]  ;;  %v187_v11 = vld [vmem:[%s534_s3 + $0x78] sm:$0xff] }
   0x5   :  { %277 = vmatmul.msk.f32.vlgmr.msra.gmra.mxu0 %vm42_vm0, %v20_v2  ;;  %287 = vmatmul.msk.f32.vlgmr.msra.gmra.mxu3 %vm42_vm0, %v30_v6  ;;  %v186_v12 = vld [vmem:[%s534_s3 + $0x70] sm:$0xff]  ;;  %v185_v13 = vld [vmem:[%s534_s3 + $0x68] sm:$0xff]  ;;  %v184_v15 = vld [vmem:[%s534_s3 + $0x60] sm:$0xff] }
   0x6   :  { %192 = vmatpush.msra.mxu1 %v187_v11  ;;  %295 = vmatpush.msra.mxu2 %v187_v11  ;;  %v26_v14 = vld [vmem:[%s532_s0 + $0x30] sm:$0xff]  ;;  %v33_v16 = vld [vmem:[%s532_s0 + $0x68] sm:$0xff]  ;;  %v183_v17 = vld [vmem:[%s534_s3 + $0x58] sm:$0xff] }
   0x7   :  { %296 = vmatpush.msrb.mxu3 %v187_v11  ;;  %v182_v18 = vld [vmem:[%s534_s3 + $0x50] sm:$0xff]  ;;  %v181_v19 = vld [vmem:[%s534_s3 + $0x48] sm:$0xff]  ;;  %v27_v20 = vld [vmem:[%s532_s0 + $0x38] sm:$0xff] }
   0x8   :  { %193 = vmatpush.msra.mxu1 %v186_v12  ;;  %297 = vmatpush.msra.mxu2 %v186_v12  ;;  %v180_v21 = vld [vmem:[%s534_s3 + $0x40] sm:$0xff]  ;;  %v34_v22 = vld [vmem:[%s532_s0 + $0x70] sm:$0xff]  ;;  %v179_v23 = vld [vmem:[%s534_s3 + $0x38] sm:$0xff] }
   0x9   :  { %298 = vmatpush.msrb.mxu3 %v186_v12  ;;  %v178_v24 = vld [vmem:[%s534_s3 + $0x30] sm:$0xff]  ;;  %v177_v25 = vld [vmem:[%s534_s3 + $0x28] sm:$0xff]  ;;  %v28_v26 = vld [vmem:[%s532_s0 + $0x40] sm:$0xff] }
   0xa   :  { %194 = vmatpush.msra.mxu1 %v185_v13  ;;  %299 = vmatpush.msra.mxu2 %v185_v13  ;;  %v176_v27 = vld [vmem:[%s534_s3 + $0x20] sm:$0xff]  ;;  %v35_v28 = vld [vmem:[%s532_s0 + $0x78] sm:$0xff]  ;;  %v29_v30 = vld [vmem:[%s532_s0 + $0x48] sm:$0xff] }
   0xb   :  { %300 = vmatpush.msrb.mxu3 %v185_v13  ;;  %v175_v29 = vld [vmem:[%s534_s3 + $0x18] sm:$0xff]  ;;  %v174_v31 = vld [vmem:[%s534_s3 + $0x10] sm:$0xff]  ;;  %v173_v32 = vld [vmem:[%s534_s3 + $0x8] sm:$0xff] }
   0xc   :  { %195 = vmatpush.msra.mxu1 %v184_v15  ;;  %301 = vmatpush.msra.mxu2 %v184_v15  ;;  %v172_v33 = vld [vmem:[%s534_s3] sm:$0xff] }
   0xd   :  { %278 = vmatmul.msk.f32.gmra.mxu0 %vm42_vm0, %v21_v3  ;;  %288 = vmatmul.msk.f32.gmra.mxu3 %vm42_vm0, %v31_v8  ;;  %v327_v34 = vld [vmem:[%s533_s2] ss:$0 sm:$0xff] }
   0xe   :  { %196 = vmatpush.msra.mxu1 %v183_v17  ;;  %302 = vmatpush.msrb.mxu3 %v184_v15 }
   0xf   :  { %303 = vmatpush.msra.mxu2 %v183_v17 }
  0x10   :  { %197 = vmatpush.msra.mxu1 %v182_v18  ;;  %304 = vmatpush.msrb.mxu3 %v183_v17 }
  0x11   :  { %305 = vmatpush.msra.mxu2 %v182_v18 }
  0x12   :  { %198 = vmatpush.msra.mxu1 %v181_v19  ;;  %306 = vmatpush.msrb.mxu3 %v182_v18 }
  0x13   :  { %307 = vmatpush.msra.mxu2 %v181_v19 }
  0x14   :  { %199 = vmatpush.msra.mxu1 %v180_v21  ;;  %308 = vmatpush.msrb.mxu3 %v181_v19  ;;  %v328_v19 = vld [vmem:[%s535_s4] ss:$0 sm:$0xff] }
  0x15   :  { %279 = vmatmul.msk.f32.gmra.mxu0 %vm42_vm0, %v22_v4  ;;  %289 = vmatmul.msk.f32.gmra.mxu3 %vm42_vm0, %v32_v10 }
  0x16   :  { %309 = vmatpush.msra.mxu2 %v180_v21  ;;  %200 = vmatpush.msra.mxu1 %v179_v23 }
  0x17   :  { %310 = vmatpush.msrb.mxu3 %v180_v21 }
  0x18   :  { %311 = vmatpush.msra.mxu2 %v179_v23  ;;  %201 = vmatpush.msra.mxu1 %v178_v24 }
  0x19   :  { %312 = vmatpush.msrb.mxu3 %v179_v23 }
  0x1a   :  { %313 = vmatpush.msra.mxu2 %v178_v24  ;;  %202 = vmatpush.msra.mxu1 %v177_v25 }
  0x1b   :  { %314 = vmatpush.msrb.mxu3 %v178_v24 }
  0x1c   :  { %315 = vmatpush.msra.mxu2 %v177_v25  ;;  %203 = vmatpush.msra.mxu1 %v176_v27 }
  0x1d   :  { %280 = vmatmul.msk.f32.gmra.mxu0 %vm42_vm0, %v23_v5  ;;  %290 = vmatmul.msk.f32.gmra.mxu3 %vm42_vm0, %v33_v16 }
  0x1e   :  { %317 = vmatpush.msra.mxu2 %v176_v27  ;;  %204 = vmatpush.msra.mxu1 %v175_v29 }
  0x1f   :  { %316 = vmatpush.msrb.mxu3 %v177_v25 }
  0x20   :  { %319 = vmatpush.msra.mxu2 %v175_v29  ;;  %205 = vmatpush.msra.mxu1 %v174_v31 }
  0x21   :  { %318 = vmatpush.msrb.mxu3 %v176_v27 }
  0x22   :  { %321 = vmatpush.msra.mxu2 %v174_v31  ;;  %206 = vmatpush.msra.mxu1 %v173_v32 }
  0x23   :  { %320 = vmatpush.msrb.mxu3 %v175_v29 }
  0x24   :  { %323 = vmatpush.msra.mxu2 %v173_v32  ;;  %207 = vmatpush.msra.mxu1 %v172_v33 }
  0x25   :  { %281 = vmatmul.msk.f32.gmra.mxu0 %vm42_vm0, %v24_v7  ;;  %291 = vmatmul.msk.f32.gmra.mxu3 %vm42_vm0, %v34_v22 }
  0x26   :  { %322 = vmatpush.msrb.mxu3 %v174_v31  ;;  %325 = vmatpush.msra.mxu2 %v172_v33 }
  0x28   :  { %324 = vmatpush.msrb.mxu3 %v173_v32 }
  0x2a   :  { %326 = vmatpush.msrb.mxu3 %v172_v33 }
  0x2d   :  { %282 = vmatmul.msk.f32.gmra.mxu0 %vm42_vm0, %v25_v9  ;;  %292 = vmatmul.msk.f32.gmra.mxu3 %vm42_vm0, %v35_v28 }
  0x35   :  { %283 = vmatmul.msk.f32.gmra.mxu0 %vm42_vm0, %v26_v14 }
  0x3d   :  { %284 = vmatmul.msk.f32.gmra.mxu0 %vm42_vm0, %v27_v20 }
  0x45   :  { %285 = vmatmul.msk.f32.gmra.mxu0 %vm42_vm0, %v28_v26 }
  0x4d   :  { %286 = vmatmul.msk.f32.gmra.mxu0 %vm42_vm0, %v29_v30 }
  0x82   :  { %v108_v35 = vpop.f32.mrf.mxu0 }
  0x83   :  { %v109_v36 = vadd.f32 %v327_v34, %v108_v35 }
  0x85   :  { %v156_v37 = vmax.f32 %v109_v36, 0.0 }
  0x87   :  { %208 = vmatmul.f32.vlgmr.msra.gmra.mxu1 %v156_v37 }
  0x88   :  { %v138_v48 = vpop.f32.mrf.mxu3 }
  0x89   :  { %v139_v11 = vadd.f32 %v327_v34, %v138_v48 }
  0x8a   :  { %v111_v38 = vpop.f32.mrf.mxu0 }
  0x8b   :  { %v112_v39 = vadd.f32 %v327_v34, %v111_v38  ;;  %v166_v12 = vmax.f32 %v139_v11, 0.0 }
  0x8d   :  { %v157_v40 = vmax.f32 %v112_v39, 0.0 }
  0x8f   :  { %211 = vmatmul.f32.gmra.mxu1 %v157_v40 }
  0x90   :  { %v141_v52 = vpop.f32.mrf.mxu3 }
  0x91   :  { %v142_v13 = vadd.f32 %v327_v34, %v141_v52 }
  0x92   :  { %v114_v41 = vpop.f32.mrf.mxu0 }
  0x93   :  { %v115_v42 = vadd.f32 %v327_v34, %v114_v41  ;;  %v167_v14 = vmax.f32 %v142_v13, 0.0 }
  0x95   :  { %v158_v43 = vmax.f32 %v115_v42, 0.0 }
  0x97   :  { %214 = vmatmul.f32.gmra.mxu1 %v158_v43 }
  0x98   :  { %v144_v56 = vpop.f32.mrf.mxu3 }
  0x99   :  { %v145_v15 = vadd.f32 %v327_v34, %v144_v56 }
  0x9a   :  { %v117_v44 = vpop.f32.mrf.mxu0 }
  0x9b   :  { %v118_v45 = vadd.f32 %v327_v34, %v117_v44  ;;  %v168_v16 = vmax.f32 %v145_v15, 0.0 }
  0x9d   :  { %v159_v46 = vmax.f32 %v118_v45, 0.0 }
  0x9f   :  { %217 = vmatmul.f32.gmra.mxu1 %v159_v46 }
  0xa0   :  { %v147_v60 = vpop.f32.mrf.mxu3 }
  0xa1   :  { %v148_v17 = vadd.f32 %v327_v34, %v147_v60 }
  0xa2   :  { %v120_v47 = vpop.f32.mrf.mxu0 }
  0xa3   :  { %v121_v49 = vadd.f32 %v327_v34, %v120_v47  ;;  %v169_v18 = vmax.f32 %v148_v17, 0.0 }
  0xa5   :  { %v160_v50 = vmax.f32 %v121_v49, 0.0 }
  0xa7   :  { %220 = vmatmul.f32.gmra.mxu1 %v160_v50 }
  0xa8   :  { %v150_v0 = vpop.f32.mrf.mxu3 }
  0xa9   :  { %v151_v2 = vadd.f32 %v327_v34, %v150_v0 }
  0xaa   :  { %v123_v51 = vpop.f32.mrf.mxu0 }
  0xab   :  { %v124_v53 = vadd.f32 %v327_v34, %v123_v51  ;;  %v170_v4 = vmax.f32 %v151_v2, 0.0 }
  0xad   :  { %v161_v54 = vmax.f32 %v124_v53, 0.0  ;;  %250 = vmatmul.f32.vlgmr.msrb.gmra.mxu3 %v170_v4 }
  0xaf   :  { %223 = vmatmul.f32.gmra.mxu1 %v161_v54 }
  0xb0   :  { %v153_v6 = vpop.f32.mrf.mxu3 }
  0xb1   :  { %v154_v8 = vadd.f32 %v327_v34, %v153_v6 }
  0xb2   :  { %v126_v55 = vpop.f32.mrf.mxu0 }
  0xb3   :  { %v127_v57 = vadd.f32 %v327_v34, %v126_v55  ;;  %v171_v10 = vmax.f32 %v154_v8, 0.0 }
  0xb5   :  { %v162_v58 = vmax.f32 %v127_v57, 0.0  ;;  %253 = vmatmul.f32.gmra.mxu3 %v171_v10 }
  0xb7   :  { %226 = vmatmul.f32.gmra.mxu1 %v162_v58 }
  0xba   :  { %v129_v59 = vpop.f32.mrf.mxu0 }
  0xbb   :  { %v130_v61 = vadd.f32 %v327_v34, %v129_v59 }
  0xbd   :  { %v163_v62 = vmax.f32 %v130_v61, 0.0 }
  0xbf   :  { %229 = vmatmul.f32.vlgmr.msra.gmra.mxu2 %v163_v62 }
  0xc2   :  { %v132_v63 = vpop.f32.mrf.mxu0 }
  0xc3   :  { %v133_v1 = vadd.f32 %v327_v34, %v132_v63 }
  0xc5   :  { %v164_v3 = vmax.f32 %v133_v1, 0.0 }
  0xc7   :  { %232 = vmatmul.f32.gmra.mxu2 %v164_v3 }
  0xca   :  { %v135_v5 = vpop.f32.mrf.mxu0 }
  0xcb   :  { %v136_v7 = vadd.f32 %v327_v34, %v135_v5 }
  0xcd   :  { %v165_v9 = vmax.f32 %v136_v7, 0.0 }
  0xcf   :  { %235 = vmatmul.f32.gmra.mxu2 %v165_v9 }
  0xd7   :  { %238 = vmatmul.f32.gmra.mxu2 %v166_v12 }
  0xdf   :  { %241 = vmatmul.f32.gmra.mxu2 %v167_v14 }
  0xe7   :  { %244 = vmatmul.f32.gmra.mxu2 %v168_v16 }
  0xef   :  { %247 = vmatmul.f32.gmra.mxu2 %v169_v18 }
 0x104   :  { %v209_v20 = vpop.f32.mrf.mxu1 }
 0x105   :  { %v210_v21 = vadd.f32 %v328_v19, %v209_v20 }
 0x107   :  { %257 = vst [vmem:[%s536_s5] sm:$0xff] %v210_v21 }
 0x10c   :  { %v212_v22 = vpop.f32.mrf.mxu1 }
 0x10d   :  { %v213_v23 = vadd.f32 %v328_v19, %v212_v22 }
 0x10f   :  { %258 = vst [vmem:[%s536_s5 + $0x8] sm:$0xff] %v213_v23 }
 0x114   :  { %v215_v24 = vpop.f32.mrf.mxu1 }
 0x115   :  { %v216_v25 = vadd.f32 %v328_v19, %v215_v24 }
 0x117   :  { %259 = vst [vmem:[%s536_s5 + $0x10] sm:$0xff] %v216_v25 }
 0x11c   :  { %v218_v26 = vpop.f32.mrf.mxu1 }
 0x11d   :  { %v219_v27 = vadd.f32 %v328_v19, %v218_v26 }
 0x11f   :  { %260 = vst [vmem:[%s536_s5 + $0x18] sm:$0xff] %v219_v27 }
 0x124   :  { %v221_v28 = vpop.f32.mrf.mxu1 }
 0x125   :  { %v222_v29 = vadd.f32 %v328_v19, %v221_v28 }
 0x127   :  { %261 = vst [vmem:[%s536_s5 + $0x20] sm:$0xff] %v222_v29 }
 0x12c   :  { %v224_v30 = vpop.f32.mrf.mxu1 }
 0x12d   :  { %v225_v31 = vadd.f32 %v328_v19, %v224_v30 }
 0x12f   :  { %262 = vst [vmem:[%s536_s5 + $0x28] sm:$0xff] %v225_v31 }
 0x130   :  { %v251_v37 = vpop.f32.mrf.mxu3 }
 0x131   :  { %v252_v39 = vadd.f32 %v328_v19, %v251_v37 }
 0x133   :  { %271 = vst [vmem:[%s536_s5 + $0x70] sm:$0xff] %v252_v39 }
 0x134   :  { %v227_v32 = vpop.f32.mrf.mxu1 }
 0x135   :  { %v228_v33 = vadd.f32 %v328_v19, %v227_v32 }
 0x137   :  { %263 = vst [vmem:[%s536_s5 + $0x30] sm:$0xff] %v228_v33 }
 0x138   :  { %v254_v41 = vpop.f32.mrf.mxu3 }
 0x139   :  { %v255_v43 = vadd.f32 %v328_v19, %v254_v41 }
 0x13b   :  { %272 = vst [vmem:[%s536_s5 + $0x78] sm:$0xff] %v255_v43 }
 0x142   :  { %v230_v34 = vpop.f32.mrf.mxu2 }
 0x143   :  { %v231_v35 = vadd.f32 %v328_v19, %v230_v34 }
 0x145   :  { %264 = vst [vmem:[%s536_s5 + $0x38] sm:$0xff] %v231_v35 }
 0x14a   :  { %v233_v36 = vpop.f32.mrf.mxu2 }
 0x14b   :  { %v234_v38 = vadd.f32 %v328_v19, %v233_v36 }
 0x14d   :  { %265 = vst [vmem:[%s536_s5 + $0x40] sm:$0xff] %v234_v38 }
 0x152   :  { %v236_v40 = vpop.f32.mrf.mxu2 }
 0x153   :  { %v237_v42 = vadd.f32 %v328_v19, %v236_v40 }
 0x155   :  { %266 = vst [vmem:[%s536_s5 + $0x48] sm:$0xff] %v237_v42 }
 0x15a   :  { %v239_v44 = vpop.f32.mrf.mxu2 }
 0x15b   :  { %v240_v45 = vadd.f32 %v328_v19, %v239_v44 }
 0x15d   :  { %267 = vst [vmem:[%s536_s5 + $0x50] sm:$0xff] %v240_v45 }
 0x162   :  { %v242_v46 = vpop.f32.mrf.mxu2 }
 0x163   :  { %v243_v47 = vadd.f32 %v328_v19, %v242_v46 }
 0x165   :  { %268 = vst [vmem:[%s536_s5 + $0x58] sm:$0xff] %v243_v47 }
 0x16a   :  { %v245_v48 = vpop.f32.mrf.mxu2 }
 0x16b   :  { %v246_v49 = vadd.f32 %v328_v19, %v245_v48 }
 0x16d   :  { %269 = vst [vmem:[%s536_s5 + $0x60] sm:$0xff] %v246_v49 }
 0x172   :  { %v248_v50 = vpop.f32.mrf.mxu2 }
 0x173   :  { %v249_v51 = vadd.f32 %v328_v19, %v248_v50 }
 0x175   :  { %270 = vst [vmem:[%s536_s5 + $0x68] sm:$0xff] %v249_v51 }

</bundles_post_ra>
